<compile_context>
chip_gen: v6e
topology: v6e:2x2x1
jax: 0.10.0
libtpu: 0.0.40
codegen_flags: <defaults>
</compile_context>

<pallas_src>
import functools
import math

import numpy as np
import jax
import jax.numpy as jnp
from jax import lax
from jax.experimental import pallas as pl
from jax.experimental.pallas import tpu as pltpu


def _round_up(x, m):
    return ((x + m - 1) // m) * m


# ---------------------------------------------------------------------------
# Single fused reverse-diffusion kernel (no grid; whole chain in one
# lax.fori_loop).  All operands are resident for the entire chain:
#   coef_ref  : SMEM (3T,) f32   [coeff1_rev | coeff2_rev | sqrt_var_rev]
#   x_ref     : VMEM (Bp, Fp)    x_T (zero-padded)
#   twt_ref   : VMEM (T, 1, Hp)  temb(t) @ Wt, reversed-time order
#   lwlc_ref  : VMEM (Bp, Hp)    label_emb(labels) @ Wl + b1   (conditional)
#   lwlu_ref  : VMEM (Bp, Hp)    label_emb(0)      @ Wl + b1   (unconditional)
#   noise_ref : VMEM (T, Bp, Fp) pre-drawn standard normal noise (reversed time)
#   w1_ref    : VMEM (Fp, Hp)    W1 (zero-padded rows/cols)
#   w2_ref    : VMEM (Hp, Fp)    W2 (zero-padded rows/cols)
#   b2_ref    : VMEM (1, Fp)     b2 (zero-padded cols)
#   out_ref   : VMEM (Bp, Fp)    x_0 (before clipping)
# ---------------------------------------------------------------------------
def _sampler_kernel(coef_ref, x_ref, twt_ref, lwlc_ref, lwlu_ref, noise_ref,
                    w1_ref, w2_ref, b2_ref, out_ref, *, T, guidance_w):
    w1 = w1_ref[...]
    w2 = w2_ref[...]
    b2 = b2_ref[...]
    lwl_c = lwlc_ref[...]
    lwl_u = lwlu_ref[...]
    gw = guidance_w

    def body(i, x):
        # tiny conditional eps-model: shared trunk, CFG applied before W2.
        base = (jnp.dot(x, w1, preferred_element_type=jnp.float32)
                + twt_ref[i])                                     # (Bp, Hp)
        h_c = jnp.tanh(base + lwl_c)
        h_u = jnp.tanh(base + lwl_u)
        hg = (1.0 + gw) * h_c - gw * h_u                          # exact CFG
        eps = jnp.dot(hg, w2, preferred_element_type=jnp.float32) + b2  # (Bp, Fp)

        # posterior step: x_{t-1} = c1*x_t - c2*eps + sqrt(var)*noise
        c1 = coef_ref[i]
        c2 = coef_ref[T + i]
        sv = coef_ref[2 * T + i]      # == 0 at the last step (t==0): noise off
        return c1 * x - c2 * eps + sv * noise_ref[i]

    out_ref[...] = lax.fori_loop(0, T, body, x_ref[...])


def _make_sampler_call(T, Bp, Fp, Hp, guidance_w):
    smem = pl.BlockSpec(memory_space=pltpu.MemorySpace.SMEM)
    vmem = pl.BlockSpec(memory_space=pltpu.MemorySpace.VMEM)
    kernel = functools.partial(_sampler_kernel, T=T, guidance_w=float(guidance_w))
    return pl.pallas_call(
        kernel,
        out_shape=jax.ShapeDtypeStruct((Bp, Fp), jnp.float32),
        in_specs=[smem, vmem, vmem, vmem, vmem, vmem, vmem, vmem, vmem],
        out_specs=vmem,
    )


# ---------------------------------------------------------------------------
# Schedules (numpy float64, mirroring the torch .double() buffers)
# ---------------------------------------------------------------------------
def cosine_beta_schedule(timesteps, s=0.008):
    steps = timesteps + 1
    x = np.linspace(0, timesteps, steps, dtype=np.float64)
    alphas_cumprod = np.cos((x / timesteps + s) / (1 + s) * math.pi * 0.5) ** 2
    alphas_cumprod = alphas_cumprod / alphas_cumprod[0]
    betas = 1 - alphas_cumprod[1:] / alphas_cumprod[:-1]
    return np.clip(betas, 0, 0.999)


def _timestep_embedding_table(T, dim):
    half = dim // 2
    freqs = np.exp(-math.log(10000.0) * np.arange(half, dtype=np.float64) / half)
    t = np.arange(T, dtype=np.float64)[:, None]
    args = t * freqs[None, :]
    return np.concatenate([np.sin(args), np.cos(args)], axis=1).astype(np.float32)


# ---------------------------------------------------------------------------
# Sampler
# ---------------------------------------------------------------------------
class GaussianDiffusionSampler:
    def __init__(self, beta_1, beta_T, T, w=0.0, schedule_name='linear',
                 C=4, L=16, E=32, H=32, num_classes=4, param_key=None):
        self.T = T
        self.w = float(w)
        self.C, self.L, self.E, self.H = C, L, E, H
        self.F = C * L
        self.Fp = _round_up(self.F, 128)          # lane-dense feature padding
        self.Hp = _round_up(H, 128)               # lane-dense hidden padding

        if schedule_name == 'linear':
            betas = np.linspace(beta_1, beta_T, T, dtype=np.float64)
        elif schedule_name == 'cosine':
            betas = cosine_beta_schedule(T, s=0.008)
        else:
            raise NotImplementedError(schedule_name)

        alphas = 1.0 - betas
        alphas_bar = np.cumprod(alphas)
        alphas_bar_prev = np.concatenate([[1.0], alphas_bar])[:T]
        coeff1 = np.sqrt(1.0 / alphas)
        coeff2 = coeff1 * (1.0 - alphas) / np.sqrt(1.0 - alphas_bar)
        posterior_var = betas * (1.0 - alphas_bar_prev) / (1.0 - alphas_bar)
        var_cat = np.concatenate([posterior_var[1:2], betas[1:]])

        # reversed-time order (loop index i -> t = T-1-i); sqrt(var)=0 at t==0.
        t_rev = np.arange(T - 1, -1, -1)
        sqrt_var_rev = np.where(t_rev > 0, np.sqrt(var_cat[t_rev]), 0.0)
        self.coeff1_np = coeff1.astype(np.float32)
        self.coeff2_np = coeff2.astype(np.float32)
        self.sqrtvar_rev_np = sqrt_var_rev.astype(np.float32)
        # flattened 1-D SMEM coefficient table: [c1_rev | c2_rev | sqrt_var_rev]
        self.coef_flat = jnp.asarray(np.concatenate(
            [coeff1[t_rev], coeff2[t_rev], sqrt_var_rev]).astype(np.float32))

        # synthetic eps-model parameters (deterministic init)
        if param_key is None:
            param_key = jax.random.PRNGKey(0)
        ks = jax.random.split(param_key, 7)
        s1 = 1.0 / math.sqrt(self.F)
        s2 = 1.0 / math.sqrt(E)
        s3 = 1.0 / math.sqrt(H)
        self.W1 = (jax.random.normal(ks[0], (self.F, H)) * s1).astype(jnp.float32)
        self.Wt = (jax.random.normal(ks[1], (E, H)) * s2).astype(jnp.float32)
        self.Wl = (jax.random.normal(ks[2], (E, H)) * s2).astype(jnp.float32)
        self.b1 = (jax.random.normal(ks[3], (1, H)) * 0.01).astype(jnp.float32)
        self.W2 = (jax.random.normal(ks[4], (H, self.F)) * s3).astype(jnp.float32)
        self.b2 = (jax.random.normal(ks[5], (1, self.F)) * 0.01).astype(jnp.float32)
        self.label_emb = jax.random.normal(ks[6], (num_classes, E)).astype(jnp.float32)

        # zero-pad to lane-dense (Fp, Hp): padded lanes never leak into real ones
        Fp, Hp = self.Fp, self.Hp
        self.W1p = jnp.zeros((Fp, Hp), jnp.float32).at[:self.F, :H].set(self.W1)
        self.W2p = jnp.zeros((Hp, Fp), jnp.float32).at[:H, :self.F].set(self.W2)
        self.b2p = jnp.zeros((1, Fp), jnp.float32).at[:, :self.F].set(self.b2)

        # time-embedding projection hoisted out of the chain: (T, 1, Hp), rev t
        self.temb_table = _timestep_embedding_table(T, E)   # np (T, E) float32
        temb_rev = jnp.asarray(np.ascontiguousarray(self.temb_table[::-1]))
        twt_rev = jnp.dot(temb_rev, self.Wt)                # (T, H)
        self.twt_rev_p = jnp.zeros((T, 1, Hp), jnp.float32).at[:, 0, :H].set(twt_rev)

    def _pad_batch(self, B):
        return max(8, _round_up(B, 8))            # sublane-dense batch padding

    def make_noise(self, B, noise_key):
        """Pre-draw all T Gaussian noises (reversed-time order, padded shapes)."""
        Bp = self._pad_batch(B)
        return jax.random.normal(noise_key, (self.T, Bp, self.Fp), dtype=jnp.float32)

    def forward(self, x_T, labels, noise_key=None, noise_rev=None):
        """x_T: (B, C, L) float32, labels: (B,) int32.  Returns clip(x_0, -1, 1)."""
        B = x_T.shape[0]
        Bp = self._pad_batch(B)
        T, H, Hp, F, Fp = self.T, self.H, self.Hp, self.F, self.Fp

        if noise_rev is None:
            noise_rev = self.make_noise(B, noise_key)

        x_pad = jnp.zeros((Bp, Fp), jnp.float32).at[:B, :F].set(
            x_T.reshape(B, F).astype(jnp.float32))

        # conditional (real labels) / unconditional (null class 0) projections,
        # constant over the whole chain -> computed once on the host.
        labels_pad = jnp.zeros((Bp,), jnp.int32).at[:B].set(labels.astype(jnp.int32))
        lwl_c = jnp.dot(self.label_emb[labels_pad], self.Wl) + self.b1      # (Bp, H)
        lwl_u = jnp.dot(jnp.broadcast_to(self.label_emb[0], (Bp, self.E)),
                        self.Wl) + self.b1                                  # (Bp, H)
        lwl_c_p = jnp.zeros((Bp, Hp), jnp.float32).at[:, :H].set(lwl_c)
        lwl_u_p = jnp.zeros((Bp, Hp), jnp.float32).at[:, :H].set(lwl_u)

        sampler_call = _make_sampler_call(T, Bp, Fp, Hp, self.w)
        x_out = sampler_call(self.coef_flat, x_pad, self.twt_rev_p,
                             lwl_c_p, lwl_u_p, noise_rev,
                             self.W1p, self.W2p, self.b2p)

        x_0 = jnp.clip(x_out[:B, :F], -1.0, 1.0)
        return x_0.reshape(B, self.C, self.L)


# ---------------------------------------------------------------------------
# Pure-JAX reference (DDPM Algorithm 2, same synthetic eps-model) for checking.
# ---------------------------------------------------------------------------
def _reference_forward(s, x_T, labels, noise_rev):
    B = x_T.shape[0]
    x = x_T.reshape(B, s.F).astype(jnp.float32)
    lwl_c = jnp.dot(s.label_emb[labels], s.Wl) + s.b1
    lwl_u = jnp.dot(jnp.broadcast_to(s.label_emb[0], (B, s.E)), s.Wl) + s.b1
    temb_rev = jnp.asarray(np.ascontiguousarray(s.temb_table[::-1]))
    for i in range(s.T):
        t = s.T - 1 - i
        base = jnp.dot(x, s.W1) + jnp.dot(temb_rev[i:i + 1], s.Wt)
        eps_c = jnp.dot(jnp.tanh(base + lwl_c), s.W2) + s.b2
        eps_u = jnp.dot(jnp.tanh(base + lwl_u), s.W2) + s.b2
        eps = (1.0 + s.w) * eps_c - s.w * eps_u
        noise = noise_rev[i, :B, :s.F]
        x = s.coeff1_np[t] * x - s.coeff2_np[t] * eps + s.sqrtvar_rev_np[i] * noise
    return jnp.clip(x, -1.0, 1.0).reshape(B, s.C, s.L)


# ---------------------------------------------------------------------------
if __name__ == "__main__":
    # HIGHEST matmul precision for host-side prep and the pure-JAX reference so
    # the comparison against the f32 in-kernel matmuls is tight.
    jax.config.update("jax_default_matmul_precision", "highest")

    B, C, L = 2, 4, 16
    T = 8
    key = jax.random.PRNGKey(0)
    k_x, k_noise, k_params = jax.random.split(key, 3)

    x_T = jax.random.normal(k_x, (B, C, L), dtype=jnp.float32)
    labels = jnp.array([1, 3], dtype=jnp.int32)

    sampler = GaussianDiffusionSampler(
        beta_1=1e-4, beta_T=0.02, T=T, w=0.5, schedule_name='linear',
        C=C, L=L, E=32, H=32, num_classes=4, param_key=k_params)

    noise_rev = sampler.make_noise(B, k_noise)     # same noise for kernel & ref

    x_0 = sampler.forward(x_T, labels, noise_rev=noise_rev)
    x_0 = jax.block_until_ready(x_0)

    x_ref = jax.block_until_ready(_reference_forward(sampler, x_T, labels, noise_rev))

    assert x_0.shape == (B, C, L)
    assert not bool(jnp.any(jnp.isnan(x_0)))
    assert bool(jnp.all(x_0 <= 1.0)) and bool(jnp.all(x_0 >= -1.0))
    max_err = float(jnp.max(jnp.abs(x_0 - x_ref)))
    assert max_err < 5e-3, f"kernel/reference mismatch: max abs err = {max_err}"
    print("KERNEL_OK")
</pallas_src>

<mosaic_0001>
module attributes {stable_mosaic.version = 11 : i64} {
  func.func @_sampler_kernel(%arg0: memref<24xf32, #tpu.memory_space<smem>>, %arg1: memref<8x128xf32, #tpu.memory_space<vmem>>, %arg2: memref<8x1x128xf32, #tpu.memory_space<vmem>>, %arg3: memref<8x128xf32, #tpu.memory_space<vmem>>, %arg4: memref<8x128xf32, #tpu.memory_space<vmem>>, %arg5: memref<8x8x128xf32, #tpu.memory_space<vmem>>, %arg6: memref<128x128xf32, #tpu.memory_space<vmem>>, %arg7: memref<128x128xf32, #tpu.memory_space<vmem>>, %arg8: memref<1x128xf32, #tpu.memory_space<vmem>>, %arg9: memref<8x128xf32, #tpu.memory_space<vmem>>) attributes {dimension_semantics = [], scalar_prefetch = 0 : i64, scratch_operands = 0 : i64, tpu.core_type = #tpu.core_type<tc>} {
    %c0 = arith.constant 0 : index
    %c0_0 = arith.constant 0 : index
    %0 = vector.load %arg6[%c0, %c0_0] : memref<128x128xf32, #tpu.memory_space<vmem>>, vector<128x128xf32>
    %c0_1 = arith.constant 0 : index
    %c0_2 = arith.constant 0 : index
    %1 = vector.load %arg7[%c0_1, %c0_2] : memref<128x128xf32, #tpu.memory_space<vmem>>, vector<128x128xf32>
    %c0_3 = arith.constant 0 : index
    %c0_4 = arith.constant 0 : index
    %2 = vector.load %arg8[%c0_3, %c0_4] : memref<1x128xf32, #tpu.memory_space<vmem>>, vector<1x128xf32>
    %c0_5 = arith.constant 0 : index
    %c0_6 = arith.constant 0 : index
    %3 = vector.load %arg3[%c0_5, %c0_6] : memref<8x128xf32, #tpu.memory_space<vmem>>, vector<8x128xf32>
    %c0_7 = arith.constant 0 : index
    %c0_8 = arith.constant 0 : index
    %4 = vector.load %arg4[%c0_7, %c0_8] : memref<8x128xf32, #tpu.memory_space<vmem>>, vector<8x128xf32>
    %c0_9 = arith.constant 0 : index
    %c0_10 = arith.constant 0 : index
    %5 = vector.load %arg1[%c0_9, %c0_10] : memref<8x128xf32, #tpu.memory_space<vmem>>, vector<8x128xf32>
    %c0_i32 = arith.constant 0 : i32
    %c8_i32 = arith.constant 8 : i32
    %6 = arith.addi %c0_i32, %c8_i32 : i32
    %c1_i32 = arith.constant 1 : i32
    %7 = scf.for %arg10 = %c0_i32 to %6 step %c1_i32 iter_args(%arg11 = %5) -> (vector<8x128xf32>)  : i32 {
      %cst = arith.constant dense<0.000000e+00> : vector<8x128xf32>
      %9 = tpu.matmul %arg11, %0, %cst {dimension_numbers = #tpu.dot_dimension_numbers<[1], [0], [0], [1], [0, 0, 1, 1], [], []>, precision = #tpu.contract_precision<fp32>} : vector<8x128xf32>, vector<128x128xf32>, vector<8x128xf32> -> vector<8x128xf32>
      %10 = arith.index_cast %arg10 : i32 to index
      %c0_14 = arith.constant 0 : index
      %c0_15 = arith.constant 0 : index
      %11 = vector.load %arg2[%10, %c0_14, %c0_15] : memref<8x1x128xf32, #tpu.memory_space<vmem>>, vector<1x1x128xf32>
      %12 = vector.shape_cast %11 : vector<1x1x128xf32> to vector<1x128xf32>
      %13 = vector.broadcast %12 : vector<1x128xf32> to vector<8x128xf32>
      %14 = arith.addf %9, %13 : vector<8x128xf32>
      %15 = arith.addf %14, %3 : vector<8x128xf32>
      %16 = math.tanh %15 : vector<8x128xf32>
      %17 = arith.addf %14, %4 : vector<8x128xf32>
      %18 = math.tanh %17 : vector<8x128xf32>
      %cst_16 = arith.constant 1.500000e+00 : f32
      %19 = vector.broadcast %cst_16 : f32 to vector<8x128xf32>
      %20 = arith.mulf %19, %16 : vector<8x128xf32>
      %cst_17 = arith.constant 5.000000e-01 : f32
      %21 = vector.broadcast %cst_17 : f32 to vector<8x128xf32>
      %22 = arith.mulf %21, %18 : vector<8x128xf32>
      %23 = arith.subf %20, %22 : vector<8x128xf32>
      %cst_18 = arith.constant dense<0.000000e+00> : vector<8x128xf32>
      %24 = tpu.matmul %23, %1, %cst_18 {dimension_numbers = #tpu.dot_dimension_numbers<[1], [0], [0], [1], [0, 0, 1, 1], [], []>, precision = #tpu.contract_precision<fp32>} : vector<8x128xf32>, vector<128x128xf32>, vector<8x128xf32> -> vector<8x128xf32>
      %25 = vector.broadcast %2 : vector<1x128xf32> to vector<8x128xf32>
      %26 = arith.addf %24, %25 : vector<8x128xf32>
      %27 = arith.index_cast %arg10 : i32 to index
      %28 = memref.load %arg0[%27] : memref<24xf32, #tpu.memory_space<smem>>
      %c8_i32_19 = arith.constant 8 : i32
      %29 = arith.addi %c8_i32_19, %arg10 : i32
      %30 = arith.index_cast %29 : i32 to index
      %31 = memref.load %arg0[%30] : memref<24xf32, #tpu.memory_space<smem>>
      %c16_i32 = arith.constant 16 : i32
      %32 = arith.addi %c16_i32, %arg10 : i32
      %33 = arith.index_cast %32 : i32 to index
      %34 = memref.load %arg0[%33] : memref<24xf32, #tpu.memory_space<smem>>
      %35 = vector.broadcast %28 : f32 to vector<8x128xf32>
      %36 = arith.mulf %35, %arg11 : vector<8x128xf32>
      %37 = vector.broadcast %31 : f32 to vector<8x128xf32>
      %38 = arith.mulf %37, %26 : vector<8x128xf32>
      %39 = arith.subf %36, %38 : vector<8x128xf32>
      %40 = arith.index_cast %arg10 : i32 to index
      %c0_20 = arith.constant 0 : index
      %c0_21 = arith.constant 0 : index
      %41 = vector.load %arg5[%40, %c0_20, %c0_21] : memref<8x8x128xf32, #tpu.memory_space<vmem>>, vector<1x8x128xf32>
      %42 = vector.shape_cast %41 : vector<1x8x128xf32> to vector<8x128xf32>
      %43 = vector.broadcast %34 : f32 to vector<8x128xf32>
      %44 = arith.mulf %43, %42 : vector<8x128xf32>
      %45 = arith.addf %39, %44 : vector<8x128xf32>
      scf.yield %45 : vector<8x128xf32>
    }
    %c8_i32_11 = arith.constant 8 : i32
    %c0_12 = arith.constant 0 : index
    %c0_13 = arith.constant 0 : index
    %8 = vector.load %arg9[%c0_12, %c0_13] : memref<8x128xf32, #tpu.memory_space<vmem>>, vector<8x128xf32>
    tpu.vector_store %arg9[%c0_12, %c0_13], %7 {strides = array<i32>} : memref<8x128xf32, #tpu.memory_space<vmem>>, vector<8x128xf32>,
    return
  }
}

</mosaic_0001>

<bundles_post_ra>
// kernel: tpu_custom_call.1
= control target key start
LH: loop header
LB: loop body
LE: loop exit
PB: predicated region body
PF: predicated region fallthrough
CT: control target
= control target key end

     0   :  { %14 = vsyncpa [#allocation5], 0  ;;  %s3370_s0 = inlined_call_operand.hbm [shape: f32[24], index: 0, kind: input, shape index: {}]   ;;  %s3371_s1 = inlined_call_operand.hbm [shape: f32[8,128], index: 1, kind: input, shape index: {}]   ;;  %s3372_s2 = inlined_call_operand.hbm [shape: f32[8,1,128], index: 2, kind: input, shape index: {}]   ;;  %s3373_s3 = inlined_call_operand.hbm [shape: f32[8,128], index: 3, kind: input, shape index: {}]   ;;  %s3374_s4 = inlined_call_operand.hbm [shape: f32[8,128], index: 4, kind: input, shape index: {}]   ;;  %s3375_s5 = inlined_call_operand.hbm [shape: f32[8,8,128], index: 5, kind: input, shape index: {}]   ;;  %s3376_s6 = inlined_call_operand.hbm [shape: f32[128,128], index: 6, kind: input, shape index: {}]   ;;  %s3377_s7 = inlined_call_operand.hbm [shape: f32[128,128], index: 7, kind: input, shape index: {}]   ;;  %s3378_s8 = inlined_call_operand.vmem [shape: f32[1,128], index: 8, kind: input, shape index: {}]   ;;  %s3379_s9 = inlined_call_operand.hbm [shape: f32[8,128], index: 9, kind: output, shape index: {}]  }
   0x1   :  { %15 = vsyncpa [#allocation3], 0 }
   0x2   :  { %16 = vsyncpa [#allocation8], 0 }
   0x3   :  { %17 = vsyncpa [#allocation11], 0 }
   0x4   :  { %18 = vsyncpa [#allocation14], 0 }
   0x5   :  { %19 = vsyncpa [#allocation4], 0  ;;  %s2384_s30 = smov [#allocation7]  }
   0x6   :  { %s43_s10 = sshll.u32 %s2384_s30, 4  ;;  %s44_s10 = int_to_ptr.vmem [resolvable:$true] %s43_s10 }
   0x7   :  { %s2196_s11 = scalar_lea.vmem %s44_s10, 128  ;;  %p2201_p1 = scmp.lt.s32.totalorder %s44_s10, %s44_s10 }
   0x8   :  { %p2197_p0 = scmp.ne.s32.totalorder %s44_s10, %s2196_s11  ;;  %p2202_p2 = scmp.lt.s32.totalorder %s2196_s11, %s2196_s11 }
   0xa   :  { %p2203_p3 = por %p2202_p2, %p2201_p1 }
   0xc   :  { %p2204_p4 = pnand %p2203_p3, %p2197_p0 }
   0xe   :  { %2207 = shalt.err (!%p2204_p4)
}
   0xf   :  { %s2385_s12 = smov 16   ;;  %s2386_s13 = smov 1  }
  0x10   :  { %49 = dma.hbm_to_vmem [thread:$0]  %s3372_s2, 128, %s44_s10, [#allocation8], %s2385_s12, %s2385_s12, %s2386_s13  }
  0x11   :  { %s2387_s16 = smov [#allocation10]  }
  0x12   :  { %s66_s17 = sshll.u32 %s2387_s16, 4  ;;  %s67_s17 = int_to_ptr.vmem [resolvable:$true] %s66_s17 }
  0x13   :  { %s2216_s18 = scalar_lea.vmem %s67_s17, 128  ;;  %p2221_p6 = scmp.lt.s32.totalorder %s67_s17, %s67_s17 }
  0x14   :  { %p2217_p5 = scmp.ne.s32.totalorder %s67_s17, %s2216_s18  ;;  %p2222_p7 = scmp.lt.s32.totalorder %s2216_s18, %s2216_s18 }
  0x16   :  { %p2223_p8 = por %p2222_p7, %p2221_p6 }
  0x18   :  { %p2224_p9 = pnand %p2223_p8, %p2217_p5 }
  0x1a   :  { %2227 = shalt.err (!%p2224_p9)
}
  0x1b   :  { %69 = dma.hbm_to_vmem [thread:$0]  %s3374_s4, 128, %s67_s17, [#allocation11]  }
  0x1c   :  { %s2388_s21 = smov [#allocation13]   ;;  %s2389_s23 = smov [#allocation6]  }
  0x1d   :  { %s87_s22 = sshll.u32 %s2388_s21, 4  ;;  %s34_s24 = sshll.u32 %s2389_s23, 4  ;;  %s88_s22 = int_to_ptr.vmem [resolvable:$true] %s87_s22  ;;  %s35_s24 = int_to_ptr.vmem [resolvable:$true] %s34_s24 }
  0x1e   :  { %s2236_s2 = scalar_lea.vmem %s88_s22, 2048  ;;  %p2241_p11 = scmp.lt.s32.totalorder %s88_s22, %s88_s22 }
  0x1f   :  { %p2237_p10 = scmp.ne.s32.totalorder %s88_s22, %s2236_s2  ;;  %p2242_p12 = scmp.lt.s32.totalorder %s2236_s2, %s2236_s2 }
  0x21   :  { %p2243_p13 = por %p2242_p12, %p2241_p11 }
  0x23   :  { %p2244_p0 = pnand %p2243_p13, %p2237_p10 }
  0x25   :  { %2247 = shalt.err (!%p2244_p0)
}
  0x26   :  { %s2390_s25 = smov 128   ;;  %s2391_s26 = smov 8  }
  0x27   :  { %93 = dma.hbm_to_vmem [thread:$0]  %s3376_s6, 2048, %s88_s22, [#allocation14], %s2390_s25, %s2390_s25, %s2391_s26  }
  0x28   :  { %s2392_s4 = smov [#allocation2]   ;;  %s2264_s10 = scalar_lea.vmem %s35_s24, 128 }
  0x29   :  { %27 = dma.hbm_to_smem %s3370_s0, 16, %s2392_s4, [#allocation5]  }
  0x2a   :  { %p2265_p1 = scmp.ne.s32.totalorder %s35_s24, %s2264_s10  ;;  %p2269_p2 = scmp.lt.s32.totalorder %s35_s24, %s35_s24 }
  0x2b   :  { %p2270_p3 = scmp.lt.s32.totalorder %s2264_s10, %s2264_s10 }
  0x2d   :  { %p2271_p4 = por %p2270_p3, %p2269_p2 }
  0x2f   :  { %p2272_p5 = pnand %p2271_p4, %p2265_p1 }
  0x31   :  { %2275 = shalt.err (!%p2272_p5)
}
  0x32   :  { %37 = dma.hbm_to_vmem [thread:$0]  %s3371_s1, 128, %s35_s24, [#allocation3]  }
  0x33   :  { %s2393_s13 = smov [#allocation9]   ;;  %s2394_s6 = smov [#allocation12]  }
  0x34   :  { %s56_s14 = sshll.u32 %s2393_s13, 4  ;;  %s75_s15 = sshll.u32 %s2394_s6, 4  ;;  %s57_s14 = int_to_ptr.vmem [resolvable:$true] %s56_s14  ;;  %s76_s15 = int_to_ptr.vmem [resolvable:$true] %s75_s15 }
  0x35   :  { %s2284_s16 = scalar_lea.vmem %s57_s14, 128  ;;  %p2289_p7 = scmp.lt.s32.totalorder %s57_s14, %s57_s14 }
  0x36   :  { %p2285_p6 = scmp.ne.s32.totalorder %s57_s14, %s2284_s16  ;;  %p2290_p8 = scmp.lt.s32.totalorder %s2284_s16, %s2284_s16 }
  0x38   :  { %p2291_p9 = por %p2290_p8, %p2289_p7 }
  0x3a   :  { %p2292_p10 = pnand %p2291_p9, %p2285_p6 }
  0x3c   :  { %2295 = shalt.err (!%p2292_p10)
}
  0x3d   :  { %59 = dma.hbm_to_vmem [thread:$0]  %s3373_s3, 128, %s57_s14, [#allocation8]  }
  0x3e   :  { %s2304_s18 = scalar_lea.vmem %s76_s15, 1024  ;;  %p2309_p12 = scmp.lt.s32.totalorder %s76_s15, %s76_s15 }
  0x3f   :  { %p2305_p11 = scmp.ne.s32.totalorder %s76_s15, %s2304_s18  ;;  %p2310_p13 = scmp.lt.s32.totalorder %s2304_s18, %s2304_s18 }
  0x41   :  { %p2311_p0 = por %p2310_p13, %p2309_p12 }
  0x43   :  { %p2312_p1 = pnand %p2311_p0, %p2305_p11 }
  0x45   :  { %2315 = shalt.err (!%p2312_p1)
}
  0x46   :  { %81 = dma.hbm_to_vmem [thread:$0]  %s3375_s5, 1024, %s76_s15, [#allocation11], %s2390_s25, %s2390_s25, %s2391_s26  }
  0x47   :  { %s2395_s20 = smov [#allocation15]  }
  0x48   :  { %s99_s21 = sshll.u32 %s2395_s20, 4  ;;  %s100_s21 = int_to_ptr.vmem [resolvable:$true] %s99_s21 }
  0x49   :  { %s2324_s22 = scalar_lea.vmem %s100_s21, 2048  ;;  %p2329_p3 = scmp.lt.s32.totalorder %s100_s21, %s100_s21 }
  0x4a   :  { %p2325_p2 = scmp.ne.s32.totalorder %s100_s21, %s2324_s22  ;;  %p2330_p4 = scmp.lt.s32.totalorder %s2324_s22, %s2324_s22 }
  0x4c   :  { %p2331_p5 = por %p2330_p4, %p2329_p3 }
  0x4e   :  { %p2332_p6 = pnand %p2331_p5, %p2325_p2 }
  0x50   :  { %2335 = shalt.err (!%p2332_p6)
}
  0x51   :  { %105 = dma.hbm_to_vmem [thread:$0]  %s3377_s7, 2048, %s100_s21, [#allocation14], %s2390_s25, %s2390_s25, %s2391_s26  }
  0x52   :  { %2364 = dma.done.wait [#allocation5], 16  }
  0x53   :  { %2365 = vsyncadd [#allocation5], 4294967280 }
  0x54   :  { %2366 = dma.done.wait [#allocation3], 128  }
  0x55   :  { %2367 = vsyncadd [#allocation3], 4294967168 }
  0x56   :  { %2368 = dma.done.wait [#allocation8], 256  }
  0x57   :  { %2369 = vsyncadd [#allocation8], 4294967040 }
  0x58   :  { %2370 = dma.done.wait [#allocation11], 1152  }
  0x59   :  { %2371 = vsyncadd [#allocation11], 4294966144 }
  0x5a   :  { %2372 = dma.done.wait [#allocation14], 4096  }
  0x5b   :  { %2373 = vsyncadd [#allocation14], 4294963200 }
  0x5c   :  { %132 = sfence }
  0x5d   :  { %v2482_v0 = vld [vmem:[#allocation13] sm:$0xff]  ;;  %v2484_v1 = vld [vmem:[#allocation13 + $0x8] sm:$0xff]  ;;  %v2486_v2 = vld [vmem:[#allocation13 + $0x10] sm:$0xff]  ;;  %s2557_s24 = smov 0  }
  0x5e   :  { %3427 = vst [vmem:[#allocation23_spill] sm:$0xff] %v2482_v0  ;;  %3428 = vst [vmem:[#allocation24_spill] sm:$0xff] %v2484_v1  ;;  %v2488_v3 = vld [vmem:[#allocation13 + $0x18] sm:$0xff]  ;;  %v2490_v4 = vld [vmem:[#allocation13 + $0x20] sm:$0xff] }
  0x5f   :  { %3429 = vst [vmem:[#allocation25_spill] sm:$0xff] %v2486_v2  ;;  %3430 = vst [vmem:[#allocation26_spill] sm:$0xff] %v2488_v3  ;;  %v2492_v5 = vld [vmem:[#allocation13 + $0x28] sm:$0xff]  ;;  %v2494_v6 = vld [vmem:[#allocation13 + $0x30] sm:$0xff] }
  0x60   :  { %3431 = vst [vmem:[#allocation27_spill] sm:$0xff] %v2490_v4  ;;  %3432 = vst [vmem:[#allocation28_spill] sm:$0xff] %v2492_v5  ;;  %v2496_v7 = vld [vmem:[#allocation13 + $0x38] sm:$0xff]  ;;  %v2498_v8 = vld [vmem:[#allocation13 + $0x40] sm:$0xff] }
  0x61   :  { %3433 = vst [vmem:[#allocation29_spill] sm:$0xff] %v2494_v6  ;;  %3434 = vst [vmem:[#allocation30_spill] sm:$0xff] %v2496_v7  ;;  %v2500_v9 = vld [vmem:[#allocation13 + $0x48] sm:$0xff]  ;;  %v2502_v10 = vld [vmem:[#allocation13 + $0x50] sm:$0xff] }
  0x62   :  { %3435 = vst [vmem:[#allocation31_spill] sm:$0xff] %v2498_v8  ;;  %3436 = vst [vmem:[#allocation32_spill] sm:$0xff] %v2500_v9  ;;  %v2504_v11 = vld [vmem:[#allocation13 + $0x58] sm:$0xff]  ;;  %v2506_v12 = vld [vmem:[#allocation13 + $0x60] sm:$0xff] }
  0x63   :  { %3437 = vst [vmem:[#allocation33_spill] sm:$0xff] %v2502_v10  ;;  %3438 = vst [vmem:[#allocation34_spill] sm:$0xff] %v2504_v11  ;;  %v2508_v13 = vld [vmem:[#allocation13 + $0x68] sm:$0xff]  ;;  %v2510_v14 = vld [vmem:[#allocation13 + $0x70] sm:$0xff] }
  0x64   :  { %3439 = vst [vmem:[#allocation35_spill] sm:$0xff] %v2506_v12  ;;  %3440 = vst [vmem:[#allocation36_spill] sm:$0xff] %v2508_v13  ;;  %v2512_v15 = vld [vmem:[#allocation13 + $0x78] sm:$0xff]  ;;  %v2514_v16 = vld [vmem:[#allocation15] sm:$0xff] }
  0x65   :  { %3441 = vst [vmem:[#allocation37_spill] sm:$0xff] %v2510_v14  ;;  %3442 = vst [vmem:[#allocation38_spill] sm:$0xff] %v2512_v15  ;;  %v2516_v17 = vld [vmem:[#allocation15 + $0x8] sm:$0xff]  ;;  %v2518_v18 = vld [vmem:[#allocation15 + $0x10] sm:$0xff] }
  0x66   :  { %3443 = vst [vmem:[#allocation39_spill] sm:$0xff] %v2514_v16  ;;  %3444 = vst [vmem:[#allocation40_spill] sm:$0xff] %v2516_v17  ;;  %v2520_v19 = vld [vmem:[#allocation15 + $0x18] sm:$0xff]  ;;  %v2522_v20 = vld [vmem:[#allocation15 + $0x20] sm:$0xff] }
  0x67   :  { %3445 = vst [vmem:[#allocation41_spill] sm:$0xff] %v2518_v18  ;;  %3446 = vst [vmem:[#allocation42_spill] sm:$0xff] %v2520_v19  ;;  %v2524_v21 = vld [vmem:[#allocation15 + $0x28] sm:$0xff]  ;;  %v2526_v22 = vld [vmem:[#allocation15 + $0x30] sm:$0xff] }
  0x68   :  { %3447 = vst [vmem:[#allocation43_spill] sm:$0xff] %v2522_v20  ;;  %3448 = vst [vmem:[#allocation44_spill] sm:$0xff] %v2524_v21  ;;  %v2528_v23 = vld [vmem:[#allocation15 + $0x38] sm:$0xff]  ;;  %v2530_v24 = vld [vmem:[#allocation15 + $0x40] sm:$0xff] }
  0x69   :  { %3449 = vst [vmem:[#allocation45_spill] sm:$0xff] %v2526_v22  ;;  %v2532_v25 = vld [vmem:[#allocation15 + $0x48] sm:$0xff]  ;;  %v2534_v26 = vld [vmem:[#allocation15 + $0x50] sm:$0xff]  ;;  %v2536_v27 = vld [vmem:[#allocation15 + $0x58] sm:$0xff] }
  0x6a   :  { %v2538_v28 = vld [vmem:[#allocation15 + $0x60] sm:$0xff]  ;;  %v2540_v29 = vld [vmem:[#allocation15 + $0x68] sm:$0xff]  ;;  %v2542_v30 = vld [vmem:[#allocation15 + $0x70] sm:$0xff] }
  0x6b   :  { %v2544_v31 = vld [vmem:[#allocation15 + $0x78] sm:$0xff]  ;;  %v2549_v32 = vld [vmem:[%s3378_s8] ss:$0 sm:$0xff]  ;;  %v2551_v33 = vld [vmem:[#allocation9] sm:$0xff] }
  0x6c   :  { %3450 = vst [vmem:[#allocation46_spill] sm:$0xff] %v2549_v32  ;;  %v2553_v34 = vld [vmem:[#allocation10] sm:$0xff]  ;;  %v168_v35 = vld [vmem:[#allocation6] sm:$0xff]  }
  0x6d LB: > { %v3456_v17 = vld [vmem:[#allocation40_spill] sm:$0xff]  ;;  %v3457_v16 = vld [vmem:[#allocation39_spill] sm:$0xff]  ;;  %v3460_v2 = vld [vmem:[#allocation25_spill] sm:$0xff]  ;;  %3474 = vst [vmem:[#allocation47_spill] sm:$0xff] %v2378_v35  ;;  %v3423_v39 = vmov 0.0   ;;  %vm2397_vm0 = vmmov 0   ;;  %v2378_v35 = vphi %v168_v35, %v3519_v35   ;;  %s2382_s24 = sphi %s2557_s24, %s174_s24  }
  0x6e   : > { %v3454_v19 = vld [vmem:[#allocation42_spill] sm:$0xff]  ;;  %v3455_v18 = vld [vmem:[#allocation41_spill] sm:$0xff]  ;;  %v3458_v0 = vld [vmem:[#allocation23_spill] sm:$0xff]  ;;  %1733 = vmatprep.subr.mxu0 %v3423_v39  ;;  %1768 = vmatprep.subr.mxu1 %v3423_v39  ;;  %s176_s8 = scalar_lea.vmem [#allocation7], %s2382_s24  ;;  %s1480_s2 = sadd.s32 8, %s2382_s24 }
  0x6f   : > { %v3452_v21 = vld [vmem:[#allocation44_spill] sm:$0xff]  ;;  %v3453_v20 = vld [vmem:[#allocation43_spill] sm:$0xff]  ;;  %v3461_v3 = vld [vmem:[#allocation26_spill] sm:$0xff]  ;;  %1765 = vmatprep.mubr.msk.f32.mxu0 %vm2397_vm0, %v3423_v39  ;;  %1800 = vmatprep.mubr.msk.f32.mxu1 %vm2397_vm0, %v3423_v39  ;;  %s1482_s25 = sadd.s32 16, %s2382_s24  ;;  %s1479_s26 = sld [smem:[#allocation2 + %s2382_s24]] }
  0x70   : > { %v3451_v22 = vld [vmem:[#allocation45_spill] sm:$0xff]  ;;  %v3459_v1 = vld [vmem:[#allocation24_spill] sm:$0xff]  ;;  %v3462_v15 = vld [vmem:[#allocation38_spill] sm:$0xff]  ;;  %s1481_s27 = sld [smem:[#allocation2 + %s1480_s2]]  ;;  %s1528_s4 = sshll.u32 %s2382_s24, 3 }
  0x71   : > { %v3463_v14 = vld [vmem:[#allocation37_spill] sm:$0xff]  ;;  %v3464_v13 = vld [vmem:[#allocation36_spill] sm:$0xff]  ;;  %v3465_v4 = vld [vmem:[#allocation27_spill] sm:$0xff]  ;;  %v2566_v36 = vand.u32 4294901760, %v3462_v15  ;;  %s1483_s28 = sld [smem:[#allocation2 + %s1482_s25]]  ;;  %s1490_s29 = scalar_lea.vmem [#allocation12], %s1528_s4 }
  0x72   : > { %v3466_v12 = vld [vmem:[#allocation35_spill] sm:$0xff]  ;;  %v3467_v11 = vld [vmem:[#allocation34_spill] sm:$0xff]  ;;  %v3468_v5 = vld [vmem:[#allocation28_spill] sm:$0xff]  ;;  %v2569_v37 = vand.u32 4294901760, %v3463_v14  ;;  %v2572_v38 = vand.u32 4294901760, %v3464_v13  ;;  %s174_s24 = sadd.s32 1, %s2382_s24  }
  0x73   : > { %v3469_v6 = vld [vmem:[#allocation29_spill] sm:$0xff]  ;;  %v3471_v7 = vld [vmem:[#allocation30_spill] sm:$0xff]  ;;  %v3472_v8 = vld [vmem:[#allocation31_spill] sm:$0xff]  ;;  %v2576_v40 = vand.u32 4294901760, %v3466_v12  ;;  %v2580_v41 = vand.u32 4294901760, %v3467_v11  ;;  %1734 = vmatpush3.msra.mxu0 %v2566_v36  ;;  %v2588_v43 = vsub.f32 %v3462_v15, %v2566_v36  ;;  %v2740_v15 = vand.u32 4294901760, %v3458_v0 }
  0x74   : > { %v3470_v10 = vld [vmem:[#allocation33_spill] sm:$0xff]  ;;  %v3473_v9 = vld [vmem:[#allocation32_spill] sm:$0xff]  ;;  %v2592_v44 = vsub.f32 %v3463_v14, %v2569_v37  ;;  %v2599_v46 = vsub.f32 %v3464_v13, %v2572_v38  ;;  %1735 = vmatprep.subr.mxu0 %v3423_v39  ;;  %v2620_v53 = vand.u32 4294901760, %v3472_v8  ;;  %v2624_v55 = vand.u32 4294901760, %v3471_v7  ;;  %p171_p7 = scmp.ge.s32.totalorder %s174_s24, 8  }
  0x75   : > { %v2583_v42 = vand.u32 4294901760, %v3470_v10  ;;  %v2595_v45 = vand.u32 4294901760, %v3473_v9  ;;  %v2604_v47 = vsub.f32 %v3466_v12, %v2576_v40  ;;  %v2608_v48 = vsub.f32 %v3467_v11, %v2580_v41  ;;  %1736 = vmatpush3.msra.mxu0 %v2569_v37  ;;  %s2398_s30 = smov (%p171_p7), [#allocation16]  }
  0x76   : > { %v3381_v49 = vand.u32 4294901760, %v2588_v43  ;;  %v3380_v50 = vand.u32 4294901760, %v2592_v44  ;;  %v3382_v51 = vand.u32 4294901760, %v2599_v46  ;;  %1737 = vmatprep.subr.mxu0 %v3423_v39  ;;  %v2643_v61 = vand.u32 4294901760, %v3469_v6  ;;  %s1502_s10 = sshll.u32 (%p171_p7), %s2398_s30, 4  ;;  %s1503_s10 = int_to_ptr.vmem [resolvable:$true] %s1502_s10 }
  0x77   : > { %v2616_v52 = vsub.f32 %v3470_v10, %v2583_v42  ;;  %v3384_v54 = vand.u32 4294901760, %v2604_v47  ;;  %v3385_v56 = vand.u32 4294901760, %v2608_v48  ;;  %1738 = vmatpush3.msra.mxu0 %v2572_v38  ;;  %v2639_v60 = vsub.f32 %v3473_v9, %v2595_v45  ;;  %s2336_s11 = scalar_lea.vmem (%p171_p7), %s1503_s10, 128  ;;  %p2341_p9 = scmp.lt.s32.totalorder (%p171_p7), %s1503_s10, %s1503_s10 }
  0x78   : > { %v279_v57 = vsub.f32 %v2588_v43, %v3381_v49  ;;  %v286_v58 = vsub.f32 %v2592_v44, %v3380_v50  ;;  %v293_v59 = vsub.f32 %v2599_v46, %v3382_v51  ;;  %1739 = vmatprep.subr.mxu0 %v3423_v39  ;;  %v2656_v9 = vsub.f32 %v3472_v8, %v2620_v53  ;;  %p2337_p8 = scmp.ne.s32.totalorder (%p171_p7), %s1503_s10, %s2336_s11  ;;  %p2342_p10 = scmp.lt.s32.totalorder (%p171_p7), %s2336_s11, %s2336_s11 }
  0x79   : > { %1740 = vmatpush3.msra.mxu0 %v2576_v40  ;;  %v300_v50 = vsub.f32 %v2604_v47, %v3384_v54  ;;  %v307_v51 = vsub.f32 %v2608_v48, %v3385_v56  ;;  %v2665_v49 = vsub.f32 %v3471_v7, %v2624_v55  ;;  %v2670_v56 = vand.u32 4294901760, %v3465_v4 }
  0x7a   : > { %v280_v62 = vand.u32 4294901760, %v279_v57  ;;  %v287_v63 = vand.u32 4294901760, %v286_v58  ;;  %1741 = vmatprep.subr.mxu0 %v3423_v39  ;;  %v294_v57 = vand.u32 4294901760, %v293_v59  ;;  %v2660_v58 = vand.u32 4294901760, %v3468_v5  ;;  %p2343_p11 = por (%p171_p7), %p2342_p10, %p2341_p9 }
  0x7b   : > { %1742 = vmatpush3.msra.mxu0 %v2580_v41  ;;  %v301_v59 = vand.u32 4294901760, %v300_v50  ;;  %v2679_v7 = vsub.f32 %v3469_v6, %v2643_v61  ;;  %v308_v10 = vand.u32 4294901760, %v307_v51  ;;  %v3476_v50 = vand.u32 4294901760, %v2639_v60 }
  0x7c   : > { %1769 = vmatpush3.msra.mxu1 %v280_v62  ;;  %1743 = vmatprep.subr.mxu0 %v3423_v39  ;;  %v3475_v62 = vand.u32 4294901760, %v2616_v52  ;;  %v2690_v54 = vsub.f32 %v3468_v5, %v2660_v58  ;;  %v2695_v6 = vand.u32 4294901760, %v3461_v3  ;;  %v2698_v51 = vand.u32 4294901760, %v2378_v35  ;;  %p2344_p12 = pnand (%p171_p7), %p2343_p11, %p2337_p8 }
  0x7d   : > { %1770 = vmatprep.subr.mxu1 %v3423_v39  ;;  %1744 = vmatpush3.msra.mxu0 %v2583_v42  ;;  %v2707_v11 = vsub.f32 %v3465_v4, %v2670_v56  ;;  %v2712_v12 = vand.u32 4294901760, %v3460_v2  ;;  %v2726_v13 = vand.u32 4294901760, %v3459_v1 }
  0x7e   : > { %1771 = vmatpush3.msra.mxu1 %v287_v63  ;;  %v314_v8 = vsub.f32 %v2616_v52, %v3475_v62  ;;  %1745 = vmatprep.subr.mxu0 %v3423_v39  ;;  %v321_v63 = vsub.f32 %v2639_v60, %v3476_v50  ;;  %v3477_v50 = vand.u32 4294901760, %v2656_v9  ;;  %v2721_v4 = vsub.f32 %v2378_v35, %v2698_v51 }
  0x7f   : > { %1772 = vmatprep.subr.mxu1 %v3423_v39  ;;  %1746 = vmatpush3.msra.mxu0 %v2595_v45  ;;  %v2767_v35 = vsub.f32 %v3458_v0, %v2740_v15 }
  0x80   : > { %1773 = vmatpush3.msra.mxu1 %v294_v57  ;;  %1747 = vmatprep.subr.mxu0 %v3423_v39  ;;  %v315_v57 = vand.u32 4294901760, %v314_v8  ;;  %v328_v62 = vsub.f32 %v2656_v9, %v3477_v50  ;;  %v322_v8 = vand.u32 4294901760, %v321_v63 }
  0x81   : > { %1774 = vmatprep.subr.mxu1 %v3423_v39  ;;  %1748 = vmatpush3.msra.mxu0 %v2620_v53 }
  0x82   : > { %1775 = vmatpush3.msra.mxu1 %v301_v59  ;;  %1749 = vmatprep.subr.mxu0 %v3423_v39  ;;  %v3478_v59 = vand.u32 4294901760, %v2665_v49  ;;  %v329_v63 = vand.u32 4294901760, %v328_v62 }
  0x83   : > { %1776 = vmatprep.subr.mxu1 %v3423_v39  ;;  %1750 = vmatpush3.msra.mxu0 %v2624_v55 }
  0x84   : > { %1777 = vmatpush3.msra.mxu1 %v308_v10  ;;  %v335_v50 = vsub.f32 %v2665_v49, %v3478_v59  ;;  %1751 = vmatprep.subr.mxu0 %v3423_v39  ;;  %v2730_v10 = vsub.f32 %v3461_v3, %v2695_v6  ;;  %v3479_v59 = vand.u32 4294901760, %v2679_v7  ;;  %v2744_v3 = vsub.f32 %v3460_v2, %v2712_v12 }
  0x85   : > { %1778 = vmatprep.subr.mxu1 %v3423_v39  ;;  %1752 = vmatpush3.msra.mxu0 %v2643_v61  ;;  %v2756_v2 = vsub.f32 %v3459_v1, %v2726_v13 }
  0x86   : > { %1779 = vmatpush3.msra.mxu1 %v315_v57  ;;  %v342_v5 = vsub.f32 %v2679_v7, %v3479_v59  ;;  %1753 = vmatprep.subr.mxu0 %v3423_v39  ;;  %v336_v62 = vand.u32 4294901760, %v335_v50  ;;  %v3480_v57 = vand.u32 4294901760, %v2690_v54  ;;  %v3481_v50 = vand.u32 4294901760, %v2707_v11 }
  0x87   : > { %1780 = vmatprep.subr.mxu1 %v3423_v39  ;;  %1754 = vmatpush3.msra.mxu0 %v2660_v58  ;;  %v376_v32 = vand.u32 4294901760, %v2756_v2 }
  0x88   : > { %1781 = vmatpush3.msra.mxu1 %v322_v8  ;;  %v349_v59 = vsub.f32 %v2690_v54, %v3480_v57  ;;  %1755 = vmatprep.subr.mxu0 %v3423_v39  ;;  %v343_v8 = vand.u32 4294901760, %v342_v5  ;;  %v356_v57 = vsub.f32 %v2707_v11, %v3481_v50  ;;  %v3482_v5 = vand.u32 4294901760, %v2721_v4 }
  0x89   : > { %1782 = vmatprep.subr.mxu1 %v3423_v39  ;;  %1756 = vmatpush3.msra.mxu0 %v2670_v56  ;;  %v3483_v50 = vand.u32 4294901760, %v2730_v10 }
  0x8a   : > { %1783 = vmatpush3.msra.mxu1 %v329_v63  ;;  %1757 = vmatprep.subr.mxu0 %v3423_v39  ;;  %v350_v1 = vand.u32 4294901760, %v349_v59  ;;  %v268_v63 = vsub.f32 %v2721_v4, %v3482_v5  ;;  %v357_v0 = vand.u32 4294901760, %v356_v57  ;;  %v383_v5 = vand.u32 4294901760, %v2767_v35 }
  0x8b   : > { %1784 = vmatprep.subr.mxu1 %v3423_v39  ;;  %1758 = vmatpush3.msra.mxu0 %v2695_v6  ;;  %v363_v14 = vsub.f32 %v2730_v10, %v3483_v50  ;;  %v377_v57 = vsub.f32 %v2756_v2, %v376_v32 }
  0x8c   : > { %1785 = vmatpush3.msra.mxu1 %v336_v62  ;;  %1759 = vmatprep.subr.mxu0 %v3423_v39  ;;  %v3484_v62 = vand.u32 4294901760, %v2744_v3  ;;  %v269_v50 = vand.u32 4294901760, %v268_v63  ;;  %v384_v63 = vsub.f32 %v2767_v35, %v383_v5 }
  0x8d   : > { %1786 = vmatprep.subr.mxu1 %v3423_v39  ;;  %1760 = vmatpush3.msra.mxu0 %v2712_v12 }
  0x8e   : > { %1787 = vmatpush3.msra.mxu1 %v343_v8  ;;  %1761 = vmatprep.subr.mxu0 %v3423_v39  ;;  %v370_v59 = vsub.f32 %v2744_v3, %v3484_v62  ;;  %v364_v8 = vand.u32 4294901760, %v363_v14  ;;  %v378_v14 = vand.u32 4294901760, %v377_v57  ;;  %v3485_v62 = vand.u32 4294901760, %v2588_v43 }
  0x8f   : > { %1788 = vmatprep.subr.mxu1 %v3423_v39  ;;  %1762 = vmatpush3.msra.mxu0 %v2726_v13 }
  0x90   : > { %1789 = vmatpush3.msra.mxu1 %v350_v1  ;;  %1763 = vmatprep.subr.mxu0 %v3423_v39  ;;  %v371_v1 = vand.u32 4294901760, %v370_v59  ;;  %v3486_v59 = vand.u32 4294901760, %v2592_v44 }
  0x91   : > { %1790 = vmatprep.subr.mxu1 %v3423_v39  ;;  %1764 = vmatpush3.msra.mxu0 %v2740_v15 }
  0x92   : > { %1791 = vmatpush3.msra.mxu1 %v357_v0  ;;  %1803 = vmatprep.subr.mxu0 %v3423_v39  ;;  %v385_v0 = vand.u32 4294901760, %v384_v63 }
  0x93   : > { %1792 = vmatprep.subr.mxu1 %v3423_v39  ;;  %1766 = vmatmul.mubr.f32.vlgmr.msra.gmra.mxu0 %v269_v50  ;;  %v3487_v50 = vand.u32 4294901760, %v2599_v46 }
  0x94   : > { %1793 = vmatpush3.msra.mxu1 %v364_v8  ;;  %1804 = vmatpush3.msra.mxu0 %v2588_v43  ;;  %v3488_v43 = vand.u32 4294901760, %v2604_v47  ;;  %v3491_v8 = vand.u32 4294901760, %v2616_v52 }
  0x95   : > { %1794 = vmatprep.subr.mxu1 %v3423_v39  ;;  %1805 = vmatprep.subr.mxu0 %v3423_v39 }
  0x96   : > { %1795 = vmatpush3.msra.mxu1 %v371_v1  ;;  %1806 = vmatpush3.msra.mxu0 %v2592_v44  ;;  %v3489_v44 = vand.u32 4294901760, %v2721_v4 }
  0x97   : > { %1796 = vmatprep.subr.mxu1 %v3423_v39  ;;  %1807 = vmatprep.subr.mxu0 %v3423_v39 }
  0x98   : > { %1797 = vmatpush3.msra.mxu1 %v378_v14  ;;  %1808 = vmatpush3.msra.mxu0 %v2599_v46  ;;  %v3490_v46 = vand.u32 4294901760, %v2608_v48 }
  0x99   : > { %1798 = vmatprep.subr.mxu1 %v3423_v39  ;;  %1809 = vmatprep.subr.mxu0 %v3423_v39 }
  0x9a   : > { %1799 = vmatpush3.msra.mxu1 %v385_v0  ;;  %1810 = vmatpush3.msra.mxu0 %v2604_v47  ;;  %v3054_v0 = vand.u32 4294901760, %v2530_v24 }
  0x9b   : > { %1801 = vmatmul.mubr.f32.vlgmr.msra.gmra.mxu1 %v2698_v51  ;;  %1811 = vmatprep.subr.mxu0 %v3423_v39 }
  0x9c   : > { %1838 = vmatprep.subr.mxu1 %v3423_v39  ;;  %1812 = vmatpush3.msra.mxu0 %v2608_v48 }
  0x9d   : > { %1839 = vmatpush3.msra.mxu1 %v2566_v36  ;;  %1813 = vmatprep.subr.mxu0 %v3423_v39 }
  0x9e   : > { %1840 = vmatprep.subr.mxu1 %v3423_v39  ;;  %1814 = vmatpush3.msra.mxu0 %v2616_v52  ;;  %v3013_v52 = vand.u32 4294901760, %v2536_v27 }
  0x9f   : > { %1841 = vmatpush3.msra.mxu1 %v2569_v37  ;;  %1815 = vmatprep.subr.mxu0 %v3423_v39 }
  0xa0   : > { %1842 = vmatprep.subr.mxu1 %v3423_v39  ;;  %1816 = vmatpush3.msra.mxu0 %v2639_v60 }
  0xa1   : > { %1843 = vmatpush3.msra.mxu1 %v2572_v38  ;;  %1817 = vmatprep.subr.mxu0 %v3423_v39 }
  0xa2   : > { %1844 = vmatprep.subr.mxu1 %v3423_v39  ;;  %1818 = vmatpush3.msra.mxu0 %v2656_v9 }
  0xa3   : > { %1845 = vmatpush3.msra.mxu1 %v2576_v40  ;;  %1819 = vmatprep.subr.mxu0 %v3423_v39 }
  0xa4   : > { %1846 = vmatprep.subr.mxu1 %v3423_v39  ;;  %1820 = vmatpush3.msra.mxu0 %v2665_v49 }
  0xa5   : > { %1847 = vmatpush3.msra.mxu1 %v2580_v41  ;;  %1821 = vmatprep.subr.mxu0 %v3423_v39 }
  0xa6   : > { %1848 = vmatprep.subr.mxu1 %v3423_v39  ;;  %1822 = vmatpush3.msra.mxu0 %v2679_v7 }
  0xa7   : > { %1849 = vmatpush3.msra.mxu1 %v2583_v42  ;;  %1823 = vmatprep.subr.mxu0 %v3423_v39 }
  0xa8   : > { %1850 = vmatprep.subr.mxu1 %v3423_v39  ;;  %1824 = vmatpush3.msra.mxu0 %v2690_v54 }
  0xa9   : > { %1851 = vmatpush3.msra.mxu1 %v2595_v45  ;;  %1825 = vmatprep.subr.mxu0 %v3423_v39 }
  0xaa   : > { %1852 = vmatprep.subr.mxu1 %v3423_v39  ;;  %1826 = vmatpush3.msra.mxu0 %v2707_v11 }
  0xab   : > { %1853 = vmatpush3.msra.mxu1 %v2620_v53  ;;  %1827 = vmatprep.subr.mxu0 %v3423_v39 }
  0xac   : > { %1854 = vmatprep.subr.mxu1 %v3423_v39  ;;  %1828 = vmatpush3.msra.mxu0 %v2730_v10 }
  0xad   : > { %1855 = vmatpush3.msra.mxu1 %v2624_v55  ;;  %1829 = vmatprep.subr.mxu0 %v3423_v39 }
  0xae   : > { %1856 = vmatprep.subr.mxu1 %v3423_v39  ;;  %1830 = vmatpush3.msra.mxu0 %v2744_v3 }
  0xaf   : > { %1857 = vmatpush3.msra.mxu1 %v2643_v61  ;;  %1831 = vmatprep.subr.mxu0 %v3423_v39 }
  0xb0   : > { %1858 = vmatprep.subr.mxu1 %v3423_v39  ;;  %1832 = vmatpush3.msra.mxu0 %v2756_v2  ;;  %v2969_v2 = vand.u32 4294901760, %v2544_v31 }
  0xb1   : > { %1859 = vmatpush3.msra.mxu1 %v2660_v58  ;;  %1833 = vmatprep.subr.mxu0 %v3423_v39 }
  0xb2   : > { %1860 = vmatprep.subr.mxu1 %v3423_v39  ;;  %1834 = vmatpush3.msra.mxu0 %v2767_v35 }
  0xb3   : > { %1835 = vmatprep.mubr.msk.f32.mxu0 %vm2397_vm0, %v3423_v39  ;;  %1861 = vmatpush3.msra.mxu1 %v2670_v56 }
  0xb4   : > { %1836 = vmatmul.mubr.f32.vlgmr.msra.gmra.mxu0 %v2721_v4  ;;  %1862 = vmatprep.subr.mxu1 %v3423_v39  ;;  %v3492_v4 = vand.u32 4294901760, %v2639_v60  ;;  %v3026_v60 = vand.u32 4294901760, %v2534_v26 }
  0xb5   : > { %1873 = vmatprep.subr.mxu0 %v3423_v39  ;;  %1863 = vmatpush3.msra.mxu1 %v2695_v6 }
  0xb6   : > { %1874 = vmatpush3.msra.mxu0 %v3485_v62  ;;  %1864 = vmatprep.subr.mxu1 %v3423_v39 }
  0xb7   : > { %1875 = vmatprep.subr.mxu0 %v3423_v39  ;;  %1865 = vmatpush3.msra.mxu1 %v2712_v12 }
  0xb8   : > { %1876 = vmatpush3.msra.mxu0 %v3486_v59  ;;  %1866 = vmatprep.subr.mxu1 %v3423_v39 }
  0xb9   : > { %1877 = vmatprep.subr.mxu0 %v3423_v39  ;;  %1867 = vmatpush3.msra.mxu1 %v2726_v13 }
  0xba   : > { %1878 = vmatpush3.msra.mxu0 %v3487_v50  ;;  %1868 = vmatprep.subr.mxu1 %v3423_v39 }
  0xbb   : > { %1879 = vmatprep.subr.mxu0 %v3423_v39  ;;  %1869 = vmatpush3.msra.mxu1 %v2740_v15 }
  0xbc   : > { %1870 = vmatprep.mubr.msk.f32.mxu1 %vm2397_vm0, %v3423_v39  ;;  %1880 = vmatpush3.msra.mxu0 %v3488_v43  ;;  %v3065_v43 = vsub.f32 %v2530_v24, %v3054_v0 }
  0xbd   : > { %1871 = vmatmul.mubr.f32.vlgmr.msra.gmra.mxu1 %v3489_v44  ;;  %1881 = vmatprep.subr.mxu0 %v3423_v39  ;;  %v3069_v44 = vand.u32 4294901760, %v2528_v23 }
  0xbe   : > { %1908 = vmatprep.subr.mxu1 %v3423_v39  ;;  %1882 = vmatpush3.msra.mxu0 %v3490_v46 }
  0xbf   : > { %1909 = vmatpush3.msra.mxu1 %v2566_v36  ;;  %1883 = vmatprep.subr.mxu0 %v3423_v39  ;;  %v3493_v36 = vand.u32 4294901760, %v2656_v9  ;;  %v3496_v9 = vand.u32 4294901760, %v2690_v54 }
  0xc0   : > { %1910 = vmatprep.subr.mxu1 %v3423_v39  ;;  %1884 = vmatpush3.msra.mxu0 %v3491_v8 }
  0xc1   : > { %1911 = vmatpush3.msra.mxu1 %v2569_v37  ;;  %1885 = vmatprep.subr.mxu0 %v3423_v39  ;;  %v3494_v37 = vand.u32 4294901760, %v2665_v49 }
  0xc2   : > { %1912 = vmatprep.subr.mxu1 %v3423_v39  ;;  %1886 = vmatpush3.msra.mxu0 %v3492_v4  ;;  %v3406_v4 = vand.u32 4294901760, %v3065_v43 }
  0xc3   : > { %1913 = vmatpush3.msra.mxu1 %v2572_v38  ;;  %1887 = vmatprep.subr.mxu0 %v3423_v39  ;;  %v3495_v38 = vand.u32 4294901760, %v2679_v7  ;;  %v3498_v7 = vand.u32 4294901760, %v2730_v10  ;;  %v3037_v10 = vsub.f32 %v2534_v26, %v3026_v60 }
  0xc4   : > { %1914 = vmatprep.subr.mxu1 %v3423_v39  ;;  %1888 = vmatpush3.msra.mxu0 %v3493_v36  ;;  %v3077_v36 = vand.u32 4294901760, %v3451_v22 }
  0xc5   : > { %1915 = vmatpush3.msra.mxu1 %v2576_v40  ;;  %1889 = vmatprep.subr.mxu0 %v3423_v39  ;;  %v3497_v40 = vand.u32 4294901760, %v2707_v11  ;;  %v3409_v63 = vand.u32 4294901760, %v3037_v10 }
  0xc6   : > { %1916 = vmatprep.subr.mxu1 %v3423_v39  ;;  %1890 = vmatpush3.msra.mxu0 %v3494_v37  ;;  %v3082_v37 = vsub.f32 %v2528_v23, %v3069_v44 }
  0xc7   : > { %1917 = vmatpush3.msra.mxu1 %v2580_v41  ;;  %1891 = vmatprep.subr.mxu0 %v3423_v39  ;;  %v3499_v41 = vand.u32 4294901760, %v2744_v3  ;;  %v2973_v3 = vsub.f32 %v2544_v31, %v2969_v2  ;;  %v968_v59 = vsub.f32 %v3037_v10, %v3409_v63 }
  0xc8   : > { %1918 = vmatprep.subr.mxu1 %v3423_v39  ;;  %1892 = vmatpush3.msra.mxu0 %v3495_v38 }
  0xc9   : > { %1919 = vmatpush3.msra.mxu1 %v2583_v42  ;;  %1893 = vmatprep.subr.mxu0 %v3423_v39  ;;  %v3416_v11 = vand.u32 4294901760, %v2973_v3  ;;  %v2999_v42 = vand.u32 4294901760, %v2538_v28  ;;  %v969_v46 = vand.u32 4294901760, %v968_v59 }
  0xca   : > { %1920 = vmatprep.subr.mxu1 %v3423_v39  ;;  %1894 = vmatpush3.msra.mxu0 %v3496_v9  ;;  %v982_v9 = vsub.f32 %v3065_v43, %v3406_v4 }
  0xcb   : > { %1921 = vmatpush3.msra.mxu1 %v2595_v45  ;;  %1895 = vmatprep.subr.mxu0 %v3423_v39  ;;  %v3009_v49 = vsub.f32 %v2538_v28, %v2999_v42 }
  0xcc   : > { %1922 = vmatprep.subr.mxu1 %v3423_v39  ;;  %1896 = vmatpush3.msra.mxu0 %v3497_v40  ;;  %v3090_v40 = vsub.f32 %v3451_v22, %v3077_v36 }
  0xcd   : > { %1923 = vmatpush3.msra.mxu1 %v2620_v53  ;;  %1897 = vmatprep.subr.mxu0 %v3423_v39 }
  0xce   : > { %1924 = vmatprep.subr.mxu1 %v3423_v39  ;;  %1898 = vmatpush3.msra.mxu0 %v3498_v7  ;;  %v3093_v7 = vand.u32 4294901760, %v3452_v21 }
  0xcf   : > { %1925 = vmatpush3.msra.mxu1 %v2624_v55  ;;  %1899 = vmatprep.subr.mxu0 %v3423_v39  ;;  %v3413_v55 = vand.u32 4294901760, %v3009_v49 }
  0xd0   : > { %1926 = vmatprep.subr.mxu1 %v3423_v39  ;;  %1900 = vmatpush3.msra.mxu0 %v3499_v41  ;;  %v3405_v41 = vand.u32 4294901760, %v3082_v37 }
  0xd1   : > { %1927 = vmatpush3.msra.mxu1 %v2643_v61  ;;  %1901 = vmatprep.subr.mxu0 %v3423_v39 }
  0xd2   : > { %1928 = vmatprep.subr.mxu1 %v3423_v39  ;;  %1902 = vmatpush3.msra.mxu0 %v376_v32 }
  0xd3   : > { %1929 = vmatpush3.msra.mxu1 %v2660_v58  ;;  %1903 = vmatprep.subr.mxu0 %v3423_v39  ;;  %v954_v58 = vsub.f32 %v3009_v49, %v3413_v55 }
  0xd4   : > { %1930 = vmatprep.subr.mxu1 %v3423_v39  ;;  %1904 = vmatpush3.msra.mxu0 %v383_v5  ;;  %v3040_v5 = vand.u32 4294901760, %v2532_v25 }
  0xd5   : > { %1905 = vmatprep.mubr.msk.f32.mxu0 %vm2397_vm0, %v3423_v39  ;;  %1931 = vmatpush3.msra.mxu1 %v2670_v56  ;;  %v3023_v56 = vsub.f32 %v2536_v27, %v3013_v52  ;;  %v955_v57 = vand.u32 4294901760, %v954_v58 }
  0xd6   : > { %1906 = vmatmul.mubr.f32.vlgmr.msra.gmra.mxu0 %v2698_v51  ;;  %1932 = vmatprep.subr.mxu1 %v3423_v39  ;;  %v3051_v14 = vsub.f32 %v2532_v25, %v3040_v5 }
  0xd7   : > { %1940 = vmatprep.mubr.msk.f32.mxu1 %vm2397_vm0, %v3423_v39  ;;  %1933 = vmatpush3.msra.mxu1 %v2695_v6  ;;  %v2976_v6 = vand.u32 4294901760, %v2542_v30 }
  0xd8   : > { %1943 = vmatprep.subr.mxu0 %v3423_v39  ;;  %1934 = vmatprep.subr.mxu1 %v3423_v39  ;;  %v3408_v50 = vand.u32 4294901760, %v3051_v14 }
  0xd9   : > { %1975 = vmatprep.mubr.msk.f32.mxu0 %vm2397_vm0, %v3423_v39  ;;  %1935 = vmatpush3.msra.mxu1 %v2712_v12  ;;  %v2983_v12 = vsub.f32 %v2542_v30, %v2976_v6 }
  0xda   : > { %1936 = vmatprep.subr.mxu1 %v3423_v39  ;;  %1944 = vmatpush3.msra.mxu0 %v2969_v2  ;;  %v975_v8 = vsub.f32 %v3051_v14, %v3408_v50 }
  0xdb   : > { %1937 = vmatpush3.msra.mxu1 %v2726_v13  ;;  %1945 = vmatprep.subr.mxu0 %v3423_v39  ;;  %v2986_v13 = vand.u32 4294901760, %v2540_v29  ;;  %v3415_v32 = vand.u32 4294901760, %v2983_v12 }
  0xdc   : > { %1938 = vmatprep.subr.mxu1 %v3423_v39  ;;  %1946 = vmatpush3.msra.mxu0 %v2976_v6  ;;  %v976_v38 = vand.u32 4294901760, %v975_v8 }
  0xdd   : > { %1939 = vmatpush3.msra.mxu1 %v2740_v15  ;;  %1947 = vmatprep.subr.mxu0 %v3423_v39  ;;  %v933_v15 = vsub.f32 %v2973_v3, %v3416_v11  ;;  %v2996_v35 = vsub.f32 %v2540_v29, %v2986_v13  ;;  %v940_v47 = vsub.f32 %v2983_v12, %v3415_v32 }
  0xde   : > { %1941 = vmatmul.mubr.f32.vlgmr.msra.gmra.mxu1 %v2698_v51  ;;  %1978 = vmatprep.subr.mxu1 %v3423_v39  ;;  %v3411_v51 = vand.u32 4294901760, %v3023_v56 }
  0xdf   : > { %2010 = vmatprep.mubr.msk.f32.mxu1 %vm2397_vm0, %v3423_v39  ;;  %1948 = vmatpush3.msra.mxu0 %v2986_v13  ;;  %v934_v45 = vand.u32 4294901760, %v933_v15  ;;  %v3414_v48 = vand.u32 4294901760, %v2996_v35  ;;  %v941_v53 = vand.u32 4294901760, %v940_v47  ;;  %v983_v15 = vand.u32 4294901760, %v982_v9 }
  0xe0   : > { %1949 = vmatprep.subr.mxu0 %v3423_v39  ;;  %v961_v1 = vsub.f32 %v3023_v56, %v3411_v51  ;;  %v3102_v47 = vsub.f32 %v3452_v21, %v3093_v7  ;;  %v3137_v9 = vand.u32 4294901760, %v3455_v18 }
  0xe1   : > { %1950 = vmatpush3.msra.mxu0 %v2999_v42  ;;  %1979 = vmatpush3.msra.mxu1 %v934_v45  ;;  %v947_v54 = vsub.f32 %v2996_v35, %v3414_v48  ;;  %v3404_v45 = vand.u32 4294901760, %v3090_v40 }
  0xe2   : > { %1951 = vmatprep.subr.mxu0 %v3423_v39  ;;  %1980 = vmatprep.subr.mxu1 %v3423_v39  ;;  %v962_v62 = vand.u32 4294901760, %v961_v1  ;;  %v3402_v58 = vand.u32 4294901760, %v3102_v47  ;;  %v3122_v1 = vand.u32 4294901760, %v3454_v19 }
  0xe3   : > { %1952 = vmatpush3.msra.mxu0 %v3013_v52  ;;  %1981 = vmatpush3.msra.mxu1 %v941_v53  ;;  %v948_v61 = vand.u32 4294901760, %v947_v54  ;;  %v3105_v53 = vand.u32 4294901760, %v3453_v20  ;;  %v989_v54 = vsub.f32 %v3082_v37, %v3405_v41  ;;  %v3163_v41 = vand.u32 4294901760, %v3457_v16 }
  0xe4   : > { %1953 = vmatprep.subr.mxu0 %v3423_v39  ;;  %1982 = vmatprep.subr.mxu1 %v3423_v39 }
  0xe5   : > { %1954 = vmatpush3.msra.mxu0 %v3026_v60  ;;  %1983 = vmatpush3.msra.mxu1 %v948_v61  ;;  %v996_v61 = vsub.f32 %v3090_v40, %v3404_v45 }
  0xe6   : > { %1955 = vmatprep.subr.mxu0 %v3423_v39  ;;  %1984 = vmatprep.subr.mxu1 %v3423_v39 }
  0xe7   : > { %1956 = vmatpush3.msra.mxu0 %v3040_v5  ;;  %1985 = vmatpush3.msra.mxu1 %v955_v57  ;;  %v3119_v57 = vsub.f32 %v3453_v20, %v3105_v53  ;;  %v997_v59 = vand.u32 4294901760, %v996_v61 }
  0xe8   : > { %1957 = vmatprep.subr.mxu0 %v3423_v39  ;;  %1986 = vmatprep.subr.mxu1 %v3423_v39 }
  0xe9   : > { %1958 = vmatpush3.msra.mxu0 %v3054_v0  ;;  %1987 = vmatpush3.msra.mxu1 %v962_v62  ;;  %v990_v62 = vand.u32 4294901760, %v989_v54  ;;  %v3403_v8 = vand.u32 4294901760, %v3119_v57 }
  0xea   : > { %1959 = vmatprep.subr.mxu0 %v3423_v39  ;;  %1988 = vmatprep.subr.mxu1 %v3423_v39 }
  0xeb   : > { %1960 = vmatpush3.msra.mxu0 %v3069_v44  ;;  %1989 = vmatpush3.msra.mxu1 %v969_v46  ;;  %v1003_v46 = vsub.f32 %v3102_v47, %v3402_v58  ;;  %v1010_v54 = vsub.f32 %v3119_v57, %v3403_v8  ;;  %v3146_v58 = vand.u32 4294901760, %v3456_v17 }
  0xec   : > { %1961 = vmatprep.subr.mxu0 %v3423_v39  ;;  %1990 = vmatprep.subr.mxu1 %v3423_v39 }
  0xed   : > { %1962 = vmatpush3.msra.mxu0 %v3077_v36  ;;  %1991 = vmatpush3.msra.mxu1 %v976_v38  ;;  %v3133_v38 = vsub.f32 %v3454_v19, %v3122_v1  ;;  %v3160_v45 = vsub.f32 %v3456_v17, %v3146_v58 }
  0xee   : > { %1963 = vmatprep.subr.mxu0 %v3423_v39  ;;  %1992 = vmatprep.subr.mxu1 %v3423_v39 }
  0xef   : > { %1964 = vmatpush3.msra.mxu0 %v3093_v7  ;;  %1993 = vmatpush3.msra.mxu1 %v983_v15  ;;  %v1004_v15 = vand.u32 4294901760, %v1003_v46  ;;  %v3407_v61 = vand.u32 4294901760, %v3133_v38  ;;  %v1011_v46 = vand.u32 4294901760, %v1010_v54  ;;  %v3412_v4 = vand.u32 4294901760, %v3160_v45 }
  0xf0   : > { %1965 = vmatprep.subr.mxu0 %v3423_v39  ;;  %1994 = vmatprep.subr.mxu1 %v3423_v39 }
  0xf1   : > { %1966 = vmatpush3.msra.mxu0 %v3105_v53  ;;  %1995 = vmatpush3.msra.mxu1 %v990_v62  ;;  %v3151_v62 = vsub.f32 %v3455_v18, %v3137_v9  ;;  %v1017_v8 = vsub.f32 %v3133_v38, %v3407_v61  ;;  %v3172_v61 = vsub.f32 %v3457_v16, %v3163_v41 }
  0xf2   : > { %1967 = vmatprep.subr.mxu0 %v3423_v39  ;;  %1996 = vmatprep.subr.mxu1 %v3423_v39 }
  0xf3   : > { %1968 = vmatpush3.msra.mxu0 %v3122_v1  ;;  %1997 = vmatpush3.msra.mxu1 %v997_v59  ;;  %v3410_v59 = vand.u32 4294901760, %v3151_v62  ;;  %v1018_v54 = vand.u32 4294901760, %v1017_v8  ;;  %v1031_v8 = vsub.f32 %v3160_v45, %v3412_v4  ;;  %v3417_v50 = vand.u32 4294901760, %v3172_v61 }
  0xf4   : > { %1969 = vmatprep.subr.mxu0 %v3423_v39  ;;  %1998 = vmatprep.subr.mxu1 %v3423_v39 }
  0xf5   : > { %1970 = vmatpush3.msra.mxu0 %v3137_v9  ;;  %1999 = vmatpush3.msra.mxu1 %v1004_v15  ;;  %v1024_v15 = vsub.f32 %v3151_v62, %v3410_v59  ;;  %v1038_v59 = vsub.f32 %v3172_v61, %v3417_v50  ;;  %v1526_v50 = vld [vmem:[%s176_s8] ss:$0 sm:$0xff] }
  0xf6   : > { %1971 = vmatprep.subr.mxu0 %v3423_v39  ;;  %2000 = vmatprep.subr.mxu1 %v3423_v39 }
  0xf7   : > { %1972 = vmatpush3.msra.mxu0 %v3146_v58  ;;  %2001 = vmatpush3.msra.mxu1 %v1011_v46  ;;  %v1025_v63 = vand.u32 4294901760, %v1024_v15  ;;  %v1032_v46 = vand.u32 4294901760, %v1031_v8  ;;  %v1039_v51 = vand.u32 4294901760, %v1038_v59 }
  0xf8   : > { %1973 = vmatprep.subr.mxu0 %v3423_v39  ;;  %2002 = vmatprep.subr.mxu1 %v3423_v39 }
  0xf9   : > { %1974 = vmatpush3.msra.mxu0 %v3163_v41  ;;  %2003 = vmatpush3.msra.mxu1 %v1018_v54 }
  0xfa   : > { %2013 = vmatprep.subr.mxu0 %v3423_v39  ;;  %2004 = vmatprep.subr.mxu1 %v3423_v39 }
  0xfb   : > { %2005 = vmatpush3.msra.mxu1 %v1025_v63 }
  0xfc   : > { %2006 = vmatprep.subr.mxu1 %v3423_v39 }
  0xfd   : > { %2007 = vmatpush3.msra.mxu1 %v1032_v46 }
  0xfe   : > { %2008 = vmatprep.subr.mxu1 %v3423_v39 }
  0xff   : > { %2009 = vmatpush3.msra.mxu1 %v1039_v51 }
 0x100   : > { %2048 = vmatprep.subr.mxu1 %v3423_v39 }
 0x153   : > { %v271_v54 = vpop.f32.mrf.mxu0 }
 0x154   : > { %v272_v63 = vadd.f32 %v1526_v50, %v271_v54 }
 0x155   : > { %v1767_v15 = vpop.f32.mrf.mxu0 }
 0x15b   : > { %v422_v4 = vpop.f32.mrf.mxu1 }
 0x15c   : > { %v423_v17 = vadd.f32 %v422_v4, %v272_v63 }
 0x15d   : > { %v1802_v55 = vpop.f32.mrf.mxu1 }
 0x174   : > { %v526_v8 = vpop.f32.mrf.mxu0 }
 0x175   : > { %v527_v46 = vadd.f32 %v526_v8, %v423_v17  ;;  %v3500_v17 = vmov 0.0  }
 0x176   : > { %v1837_v48 = vpop.f32.mrf.mxu0 }
 0x17d   : > { %v615_v32 = vpop.f32.mrf.mxu1 }
 0x17e   : > { %v616_v18 = vadd.f32 %v615_v32, %v527_v46  ;;  %v3509_v32 = vand.u32 4294901760, %v3082_v37 }
 0x17f   : > { %v1872_v11 = vpop.f32.mrf.mxu1 }
 0x196   : > { %v734_v16 = vpop.f32.mrf.mxu0 }
 0x197   : > { %v735_v19 = vadd.f32 %v734_v16, %v616_v18 }
 0x198   : > { %v1907_v59 = vpop.f32.mrf.mxu0 }
 0x199   : > { %v3518_v59 = vld [vmem:[#allocation47_spill] sm:$0xff] }
 0x19e   : > { %v821_v51 = vpop.f32.mrf.mxu1 }
 0x19f   : > { %v822_v20 = vadd.f32 %v821_v51, %v735_v19 }
 0x1a0   : > { %v1942_v39 = vpop.f32.mrf.mxu1 }
 0x1a1   : > { %v825_v15 = vadd.f32 %v822_v20, %v2551_v33  ;;  %v827_v55 = vadd.f32 %v822_v20, %v2553_v34  ;;  %v3503_v39 = vand.u32 4294901760, %v2996_v35 }
 0x1a3   : > { %2184 = vtanh.f32 %v825_v15 }
 0x1a4   : > { %2186 = vtanh.f32 %v827_v55 }
 0x1b0   : > { %v2185_v48 = vpop.eup %2184 }
 0x1b1   : > { %v2187_v11 = vpop.eup %2186  ;;  %v829_v21 = vmul.f32 1.5, %v2185_v48 }
 0x1b2   : > { %v830_v22 = vmul.f32 0.5, %v2187_v11 }
 0x1b4   : > { %v831_v50 = vsub.f32 %v829_v21, %v830_v22  ;;  %v3501_v21 = vand.u32 4294901760, %v2973_v3  ;;  %v3502_v22 = vand.u32 4294901760, %v2983_v12 }
 0x1b6   : > { %v3195_v54 = vand.u32 4294901760, %v831_v50 }
 0x1b8   : > { %2011 = vmatmul.mubr.f32.vlgmr.msra.gmra.mxu1 %v3195_v54  ;;  %v3199_v16 = vsub.f32 %v831_v50, %v3195_v54 }
 0x1b9   : > { %2049 = vmatpush3.msra.mxu1 %v2969_v2  ;;  %2080 = vmatprep.mubr.msk.f32.mxu1 %vm2397_vm0, %v3500_v17 }
 0x1ba   : > { %2050 = vmatprep.subr.mxu1 %v3500_v17  ;;  %v921_v18 = vand.u32 4294901760, %v3199_v16 }
 0x1bb   : > { %2051 = vmatpush3.msra.mxu1 %v2976_v6 }
 0x1bc   : > { %2052 = vmatprep.subr.mxu1 %v3500_v17  ;;  %v922_v19 = vsub.f32 %v3199_v16, %v921_v18 }
 0x1bd   : > { %2053 = vmatpush3.msra.mxu1 %v2986_v13 }
 0x1be   : > { %2054 = vmatprep.subr.mxu1 %v3500_v17  ;;  %v923_v20 = vand.u32 4294901760, %v922_v19 }
 0x1bf   : > { %2055 = vmatpush3.msra.mxu1 %v2999_v42 }
 0x1c0   : > { %2056 = vmatprep.subr.mxu1 %v3500_v17  ;;  %1976 = vmatmul.mubr.f32.vlgmr.msra.gmra.mxu0 %v923_v20 }
 0x1c1   : > { %2014 = vmatpush3.msra.mxu0 %v2973_v3  ;;  %2057 = vmatpush3.msra.mxu1 %v3013_v52  ;;  %v3505_v3 = vand.u32 4294901760, %v3023_v56 }
 0x1c2   : > { %2015 = vmatprep.subr.mxu0 %v3500_v17  ;;  %2058 = vmatprep.subr.mxu1 %v3500_v17 }
 0x1c3   : > { %2016 = vmatpush3.msra.mxu0 %v2983_v12  ;;  %2059 = vmatpush3.msra.mxu1 %v3026_v60  ;;  %v3507_v12 = vand.u32 4294901760, %v3051_v14 }
 0x1c4   : > { %2017 = vmatprep.subr.mxu0 %v3500_v17  ;;  %2060 = vmatprep.subr.mxu1 %v3500_v17 }
 0x1c5   : > { %2018 = vmatpush3.msra.mxu0 %v2996_v35  ;;  %2061 = vmatpush3.msra.mxu1 %v3040_v5  ;;  %v3510_v35 = vand.u32 4294901760, %v3090_v40 }
 0x1c6   : > { %2019 = vmatprep.subr.mxu0 %v3500_v17  ;;  %2062 = vmatprep.subr.mxu1 %v3500_v17 }
 0x1c7   : > { %2020 = vmatpush3.msra.mxu0 %v3009_v49  ;;  %2063 = vmatpush3.msra.mxu1 %v3054_v0 }
 0x1c8   : > { %2021 = vmatprep.subr.mxu0 %v3500_v17  ;;  %2064 = vmatprep.subr.mxu1 %v3500_v17 }
 0x1c9   : > { %2022 = vmatpush3.msra.mxu0 %v3023_v56  ;;  %2065 = vmatpush3.msra.mxu1 %v3069_v44  ;;  %v3514_v56 = vand.u32 4294901760, %v3151_v62 }
 0x1ca   : > { %2023 = vmatprep.subr.mxu0 %v3500_v17  ;;  %2066 = vmatprep.subr.mxu1 %v3500_v17 }
 0x1cb   : > { %2024 = vmatpush3.msra.mxu0 %v3037_v10  ;;  %2067 = vmatpush3.msra.mxu1 %v3077_v36 }
 0x1cc   : > { %2025 = vmatprep.subr.mxu0 %v3500_v17  ;;  %2068 = vmatprep.subr.mxu1 %v3500_v17 }
 0x1cd   : > { %2026 = vmatpush3.msra.mxu0 %v3051_v14  ;;  %2069 = vmatpush3.msra.mxu1 %v3093_v7 }
 0x1ce   : > { %2027 = vmatprep.subr.mxu0 %v3500_v17  ;;  %2070 = vmatprep.subr.mxu1 %v3500_v17 }
 0x1cf   : > { %2028 = vmatpush3.msra.mxu0 %v3065_v43  ;;  %2071 = vmatpush3.msra.mxu1 %v3105_v53 }
 0x1d0   : > { %2029 = vmatprep.subr.mxu0 %v3500_v17  ;;  %2072 = vmatprep.subr.mxu1 %v3500_v17 }
 0x1d1   : > { %2030 = vmatpush3.msra.mxu0 %v3082_v37  ;;  %2073 = vmatpush3.msra.mxu1 %v3122_v1 }
 0x1d2   : > { %2031 = vmatprep.subr.mxu0 %v3500_v17  ;;  %2074 = vmatprep.subr.mxu1 %v3500_v17 }
 0x1d3   : > { %2032 = vmatpush3.msra.mxu0 %v3090_v40  ;;  %2075 = vmatpush3.msra.mxu1 %v3137_v9  ;;  %v3517_v40 = vld [vmem:[#allocation46_spill] sm:$0xff] }
 0x1d4   : > { %2033 = vmatprep.subr.mxu0 %v3500_v17  ;;  %2076 = vmatprep.subr.mxu1 %v3500_v17 }
 0x1d5   : > { %2034 = vmatpush3.msra.mxu0 %v3102_v47  ;;  %2077 = vmatpush3.msra.mxu1 %v3146_v58 }
 0x1d6   : > { %2035 = vmatprep.subr.mxu0 %v3500_v17  ;;  %2078 = vmatprep.subr.mxu1 %v3500_v17 }
 0x1d7   : > { %2036 = vmatpush3.msra.mxu0 %v3119_v57  ;;  %2079 = vmatpush3.msra.mxu1 %v3163_v41 }
 0x1d8   : > { %2037 = vmatprep.subr.mxu0 %v3500_v17  ;;  %2081 = vmatmul.mubr.f32.vlgmr.msra.gmra.mxu1 %v921_v18 }
 0x1d9   : > { %2118 = vmatprep.subr.mxu1 %v3500_v17  ;;  %2038 = vmatpush3.msra.mxu0 %v3133_v38 }
 0x1da   : > { %2119 = vmatpush3.msra.mxu1 %v2969_v2  ;;  %2039 = vmatprep.subr.mxu0 %v3500_v17  ;;  %v3504_v2 = vand.u32 4294901760, %v3009_v49  ;;  %v3512_v49 = vand.u32 4294901760, %v3119_v57 }
 0x1db   : > { %2120 = vmatprep.subr.mxu1 %v3500_v17  ;;  %2040 = vmatpush3.msra.mxu0 %v3151_v62  ;;  %v1492_v62 = vstv %s1483_s28 }
 0x1dc   : > { %2121 = vmatpush3.msra.mxu1 %v2976_v6  ;;  %2041 = vmatprep.subr.mxu0 %v3500_v17  ;;  %v3506_v6 = vand.u32 4294901760, %v3037_v10  ;;  %v3516_v10 = vand.u32 4294901760, %v3172_v61 }
 0x1dd   : > { %2122 = vmatprep.subr.mxu1 %v3500_v17  ;;  %2042 = vmatpush3.msra.mxu0 %v3160_v45 }
 0x1de   : > { %2123 = vmatpush3.msra.mxu1 %v2986_v13  ;;  %2043 = vmatprep.subr.mxu0 %v3500_v17  ;;  %v3508_v13 = vand.u32 4294901760, %v3065_v43 }
 0x1df   : > { %2124 = vmatprep.subr.mxu1 %v3500_v17  ;;  %2044 = vmatpush3.msra.mxu0 %v3172_v61  ;;  %v1491_v61 = vld [vmem:[%s1490_s29] sm:$0xff] }
 0x1e0   : > { %2045 = vmatprep.mubr.msk.f32.mxu0 %vm2397_vm0, %v3500_v17  ;;  %2125 = vmatpush3.msra.mxu1 %v2999_v42  ;;  %v3511_v42 = vand.u32 4294901760, %v3102_v47  ;;  %v1493_v15 = vmul.f32 %v1492_v62, %v1491_v61 }
 0x1e1   : > { %2046 = vmatmul.mubr.f32.vlgmr.msra.gmra.mxu0 %v3199_v16  ;;  %2083 = vmatprep.subr.mxu0 %v3500_v17 }
 0x1e2   : > { %2126 = vmatprep.subr.mxu1 %v3500_v17  ;;  %2084 = vmatpush3.msra.mxu0 %v3501_v21 }
 0x1e3   : > { %2127 = vmatpush3.msra.mxu1 %v3013_v52  ;;  %2085 = vmatprep.subr.mxu0 %v3500_v17  ;;  %v3513_v52 = vand.u32 4294901760, %v3133_v38 }
 0x1e4   : > { %2128 = vmatprep.subr.mxu1 %v3500_v17  ;;  %2086 = vmatpush3.msra.mxu0 %v3502_v22 }
 0x1e5   : > { %2129 = vmatpush3.msra.mxu1 %v3026_v60  ;;  %2087 = vmatprep.subr.mxu0 %v3500_v17  ;;  %v3515_v60 = vand.u32 4294901760, %v3160_v45 }
 0x1e6   : > { %2130 = vmatprep.subr.mxu1 %v3500_v17  ;;  %2088 = vmatpush3.msra.mxu0 %v3503_v39 }
 0x1e7   : > { %2131 = vmatpush3.msra.mxu1 %v3040_v5  ;;  %2089 = vmatprep.subr.mxu0 %v3500_v17 }
 0x1e8   : > { %2132 = vmatprep.subr.mxu1 %v3500_v17  ;;  %2090 = vmatpush3.msra.mxu0 %v3504_v2 }
 0x1e9   : > { %2133 = vmatpush3.msra.mxu1 %v3054_v0  ;;  %2091 = vmatprep.subr.mxu0 %v3500_v17 }
 0x1ea   : > { %2134 = vmatprep.subr.mxu1 %v3500_v17  ;;  %2092 = vmatpush3.msra.mxu0 %v3505_v3 }
 0x1eb   : > { %2135 = vmatpush3.msra.mxu1 %v3069_v44  ;;  %2093 = vmatprep.subr.mxu0 %v3500_v17 }
 0x1ec   : > { %2136 = vmatprep.subr.mxu1 %v3500_v17  ;;  %2094 = vmatpush3.msra.mxu0 %v3506_v6 }
 0x1ed   : > { %2137 = vmatpush3.msra.mxu1 %v3077_v36  ;;  %2095 = vmatprep.subr.mxu0 %v3500_v17 }
 0x1ee   : > { %2138 = vmatprep.subr.mxu1 %v3500_v17  ;;  %2096 = vmatpush3.msra.mxu0 %v3507_v12 }
 0x1ef   : > { %2139 = vmatpush3.msra.mxu1 %v3093_v7  ;;  %2097 = vmatprep.subr.mxu0 %v3500_v17 }
 0x1f0   : > { %2140 = vmatprep.subr.mxu1 %v3500_v17  ;;  %2098 = vmatpush3.msra.mxu0 %v3508_v13 }
 0x1f1   : > { %2141 = vmatpush3.msra.mxu1 %v3105_v53  ;;  %2099 = vmatprep.subr.mxu0 %v3500_v17 }
 0x1f2   : > { %2142 = vmatprep.subr.mxu1 %v3500_v17  ;;  %2100 = vmatpush3.msra.mxu0 %v3509_v32 }
 0x1f3   : > { %2143 = vmatpush3.msra.mxu1 %v3122_v1  ;;  %2101 = vmatprep.subr.mxu0 %v3500_v17  ;;  %v1484_v1 = vstv %s1479_s26 }
 0x1f4   : > { %2144 = vmatprep.subr.mxu1 %v3500_v17  ;;  %2102 = vmatpush3.msra.mxu0 %v3510_v35  ;;  %v1485_v46 = vmul.f32 %v3518_v59, %v1484_v1 }
 0x1f5   : > { %2145 = vmatpush3.msra.mxu1 %v3137_v9  ;;  %2103 = vmatprep.subr.mxu0 %v3500_v17  ;;  %v1486_v9 = vstv %s1481_s27 }
 0x1f6   : > { %2146 = vmatprep.subr.mxu1 %v3500_v17  ;;  %2104 = vmatpush3.msra.mxu0 %v3511_v42 }
 0x1f7   : > { %2147 = vmatpush3.msra.mxu1 %v3146_v58  ;;  %2105 = vmatprep.subr.mxu0 %v3500_v17 }
 0x1f8   : > { %2148 = vmatprep.subr.mxu1 %v3500_v17  ;;  %2106 = vmatpush3.msra.mxu0 %v3512_v49 }
 0x1f9   : > { %2149 = vmatpush3.msra.mxu1 %v3163_v41  ;;  %2150 = vmatprep.mubr.msk.f32.mxu1 %vm2397_vm0, %v3500_v17 }
 0x1fa   : > { %2107 = vmatprep.subr.mxu0 %v3500_v17  ;;  %2151 = vmatmul.mubr.f32.vlgmr.msra.gmra.mxu1 %v3195_v54 }
 0x1fb   : > { %2108 = vmatpush3.msra.mxu0 %v3513_v52  ;;  %2115 = vmatprep.mubr.msk.f32.mxu0 %vm2397_vm0, %v3500_v17 }
 0x1fc   : > { %2109 = vmatprep.subr.mxu0 %v3500_v17 }
 0x1fd   : > { %2110 = vmatpush3.msra.mxu0 %v3514_v56 }
 0x1fe   : > { %2111 = vmatprep.subr.mxu0 %v3500_v17 }
 0x1ff   : > { %2112 = vmatpush3.msra.mxu0 %v3515_v60 }
 0x200   : > { %2113 = vmatprep.subr.mxu0 %v3500_v17 }
 0x201   : > { %2114 = vmatpush3.msra.mxu0 %v3516_v10 }
 0x202   : > { %2116 = vmatmul.mubr.f32.vlgmr.msra.gmra.mxu0 %v3195_v54 }
 0x278   : > { %v1076_v5 = vpop.f32.mrf.mxu1 }
 0x27a   : > { %v2012_v14 = vpop.f32.mrf.mxu1 }
 0x280   : > { %v925_v0 = vpop.f32.mrf.mxu0 }
 0x281   : > { %v926_v7 = vadd.f32 %v3517_v40, %v925_v0 }
 0x282   : > { %v1977_v43 = vpop.f32.mrf.mxu0 }
 0x283   : > { %v1077_v45 = vadd.f32 %v1076_v5, %v926_v7 }
 0x298   : > { %v1269_v44 = vpop.f32.mrf.mxu1 }
 0x29a   : > { %v2082_v4 = vpop.f32.mrf.mxu1 }
 0x2a1   : > { %v1180_v36 = vpop.f32.mrf.mxu0 }
 0x2a2   : > { %v1181_v53 = vadd.f32 %v1180_v36, %v1077_v45 }
 0x2a3   : > { %v2047_v37 = vpop.f32.mrf.mxu0 }
 0x2a4   : > { %v1270_v58 = vadd.f32 %v1269_v44, %v1181_v53 }
 0x2ba   : > { %v1475_v41 = vpop.f32.mrf.mxu1 }
 0x2bc   : > { %v2152_v47 = vpop.f32.mrf.mxu1 }
 0x2c2   : > { %v1388_v57 = vpop.f32.mrf.mxu0 }
 0x2c3   : > { %v1389_v38 = vadd.f32 %v1388_v57, %v1270_v58 }
 0x2c4   : > { %v2117_v8 = vpop.f32.mrf.mxu0 }
 0x2c5   : > { %v1476_v63 = vadd.f32 %v1475_v41, %v1389_v38 }
 0x2c7   : > { %v1487_v51 = vmul.f32 %v1486_v9, %v1476_v63 }
 0x2c9   : > { %v1488_v55 = vsub.f32 %v1485_v46, %v1487_v51  ;;  %173 = sbr.rel (!%p171_p7) target bundleno = 109 (0x6d), region = 97 }
 0x2cb   : > { %v1494_v48 = vadd.f32 %v1493_v15, %v1488_v55  }
 0x2cd   : > { %v3519_v35 = vmov %v1494_v48  ;;  %1495 = vst [vmem:[#allocation16] sm:$0xff] (%p171_p7), %v1494_v48 }
 0x2ce   :  { %2347 = shalt.err (!%p2344_p12)
}
 0x2cf   :  { %1505 = dma.vmem_to_hbm [thread:$0]  %s1503_s10, 128, %s3379_s9, [#allocation4]  }
 0x2d0   :  { %2374 = dma.done.wait [#allocation4], 128  }
 0x2d1   :  { %2375 = vsyncadd [#allocation4], 4294967168 }
 0x2d2   :  { %1509 = vsyncpa [#allocation3], 1 }
 0x2d3   :  { %1510 = vsyncpa [#allocation8], 1 }
 0x2d4   :  { %1511 = vsyncpa [#allocation11], 1 }
 0x2d5   :  { %1512 = vsyncpa [#allocation14], 1 }
 0x2d6   :  { %1513 = vsyncpa [#allocation4], 1 }
 0x2d7   :  { %1514 = vsyncpa [#allocation5], 1 }

</bundles_post_ra>
